<compile_context>
chip_gen: v5e
topology: v5e:2x2
jax: 0.10.0
libtpu: 0.0.40
codegen_flags: <defaults>
</compile_context>

<pallas_src>
import functools

import jax
import jax.numpy as jnp
import numpy as np
from jax.experimental import pallas as pl
from jax.experimental.pallas import tpu as pltpu

BN_EPS = 1e-5


def _round_up(n, m):
    return ((n + m - 1) // m) * m


def _vmem_capacity_bytes():
    try:
        return int(pltpu.get_tpu_info().vmem_capacity_bytes)
    except Exception:
        return 128 << 20  # v5e/v6e physical VMEM; conservative fallback


def _wrn34_rot_kernel(x_ref, w1_ref, b1_ref, gamma_ref, beta_ref, w2_ref, b2_ref,
                      o_ref, h_ref, sum_ref, sq_ref, *, n_valid, tb, hw):
    i = pl.program_id(0)

    @pl.when(i == 0)
    def _():
        sum_ref[...] = jnp.zeros_like(sum_ref)
        sq_ref[...] = jnp.zeros_like(sq_ref)

    # Stage 1 (every grid step): (1,1) average pool over the HW lane axis
    # (f32 accumulation, XLU reduce) + Linear(C -> 256) on the MXU (K = C).
    xt = x_ref[...].astype(jnp.float32)                     # (TB, C, HW)
    pooled = jnp.sum(xt, axis=-1) * (1.0 / float(hw))       # (TB, C)
    h = jnp.dot(pooled, w1_ref[...].astype(jnp.float32),
                preferred_element_type=jnp.float32)
    h = h + b1_ref[...].astype(jnp.float32)                 # (TB, 256) f32

    # Incremental, row-masked BatchNorm statistics: per-tile sum and
    # sum-of-squares accumulated into small VMEM scratch (hidden under the
    # x DMA of the next tile).
    row = jax.lax.broadcasted_iota(jnp.int32, (h.shape[0], 1), 0) + i * tb
    valid = (row < n_valid).astype(jnp.float32)
    hv = h * valid
    sum_ref[...] += jnp.sum(hv, axis=0, keepdims=True)
    sq_ref[...] += jnp.sum(hv * hv, axis=0, keepdims=True)

    start = pl.multiple_of(i * tb, tb)
    h_ref[pl.ds(start, tb), :] = h

    # Stage 2 (last grid step only): train-mode BatchNorm1d (biased variance over
    # the valid B rows), ReLU, Linear(256 -> 4), single output write.
    @pl.when(i == pl.num_programs(0) - 1)
    def _():
        inv_n = 1.0 / float(n_valid)
        mean = sum_ref[...] * inv_n                         # (1, 256)
        var = jnp.maximum(sq_ref[...] * inv_n - mean * mean, 0.0)
        scale = gamma_ref[...].astype(jnp.float32) * jax.lax.rsqrt(var + BN_EPS)
        shift = beta_ref[...].astype(jnp.float32) - mean * scale
        h_act = jnp.maximum(h_ref[...] * scale + shift, 0.0)
        out = jnp.dot(h_act, w2_ref[...].astype(jnp.float32),
                      preferred_element_type=jnp.float32)
        out = out + b2_ref[...].astype(jnp.float32)
        o_ref[...] = out.astype(o_ref.dtype)


def wrn34_rot_out_branch(x, w1, b1, gamma, beta, w2, b2, *, tb=512,
                         compute_dtype=jnp.bfloat16):
    """x: (B, C, H, W) NCHW. Returns (B, 4) float32 logits (PyTorch forward semantics)."""
    B, C, H, W = x.shape
    HW = H * W
    HID = w1.shape[1]
    OUT = w2.shape[1]
    assert w1.shape[0] == C, (w1.shape, C)

    # Stream activations in bf16 (HBM-bandwidth dominated); params stay f32.
    x3 = x.reshape(B, C, HW).astype(compute_dtype)
    xbytes = jnp.dtype(compute_dtype).itemsize

    def _vmem_est(tb_):
        b_pad_ = _round_up(B, tb_)
        return int(2 * tb_ * C * HW * xbytes        # double-buffered x tiles
                   + tb_ * C * HW * 4               # f32 widen temp for the pooling reduce
                   + b_pad_ * HID * 4               # persistent hidden scratch
                   + b_pad_ * OUT * 4               # output block
                   + 2 * 4 * (C * HID + 3 * HID + HID * OUT + OUT)  # params (double-buffered)
                   + (4 << 20))                     # compiler headroom

    # Batch tiling: TB a multiple of 8 (sublane); shrink until it fits the
    # generation's VMEM budget (v7x has only 64 MiB per TensorCore).
    cap = _vmem_capacity_bytes()
    budget = max(cap - (16 << 20), 24 << 20)
    TB = max(8, min((int(tb) // 8) * 8, _round_up(B, 8)))
    while TB > 8 and _vmem_est(TB) > budget:
        TB = max(8, ((TB // 2) // 8) * 8)

    B_pad = _round_up(B, TB)
    if B_pad != B:
        x3 = jnp.pad(x3, ((0, B_pad - B), (0, 0), (0, 0)))

    grid = (B_pad // TB,)
    vmem_limit = int(min(max(_vmem_est(TB), 32 << 20), budget))

    kernel = functools.partial(_wrn34_rot_kernel, n_valid=B, tb=TB, hw=HW)

    out_pad = pl.pallas_call(
        kernel,
        out_shape=jax.ShapeDtypeStruct((B_pad, OUT), jnp.float32),
        grid_spec=pltpu.PrefetchScalarGridSpec(
            num_scalar_prefetch=0,
            grid=grid,
            in_specs=[
                pl.BlockSpec((TB, C, HW), lambda i: (i, 0, 0)),   # x tile (streamed, bf16)
                pl.BlockSpec((C, HID), lambda i: (0, 0)),         # w1 (tiny, VMEM-resident)
                pl.BlockSpec((1, HID), lambda i: (0, 0)),         # b1
                pl.BlockSpec((1, HID), lambda i: (0, 0)),         # gamma
                pl.BlockSpec((1, HID), lambda i: (0, 0)),         # beta
                pl.BlockSpec((HID, OUT), lambda i: (0, 0)),       # w2
                pl.BlockSpec((1, OUT), lambda i: (0, 0)),         # b2
            ],
            out_specs=pl.BlockSpec((B_pad, OUT), lambda i: (0, 0)),
            scratch_shapes=[
                pltpu.VMEM((B_pad, HID), jnp.float32),   # persistent hidden activations
                pltpu.VMEM((1, HID), jnp.float32),       # running sum (BN)
                pltpu.VMEM((1, HID), jnp.float32),       # running sum of squares (BN)
            ],
        ),
        compiler_params=pltpu.CompilerParams(
            dimension_semantics=("arbitrary",),   # BN finalize depends on every batch tile
            vmem_limit_bytes=vmem_limit,
        ),
    )(x3, w1, b1, gamma, beta, w2, b2)

    return out_pad[:B]


def init_params(key, in_dim=19, hidden=256, out_dim=4):
    """Deterministic init mimicking PyTorch Linear / BatchNorm1d defaults."""
    k1, k2, k3, k4 = jax.random.split(key, 4)
    bound1 = 1.0 / float(np.sqrt(in_dim))
    w1 = jax.random.uniform(k1, (in_dim, hidden), jnp.float32, -bound1, bound1)
    b1 = jax.random.uniform(k2, (1, hidden), jnp.float32, -bound1, bound1)
    gamma = jnp.ones((1, hidden), jnp.float32)   # BatchNorm1d weight
    beta = jnp.zeros((1, hidden), jnp.float32)   # BatchNorm1d bias
    bound2 = 1.0 / float(np.sqrt(hidden))
    w2 = jax.random.uniform(k3, (hidden, out_dim), jnp.float32, -bound2, bound2)
    b2 = jax.random.uniform(k4, (1, out_dim), jnp.float32, -bound2, bound2)
    return w1, b1, gamma, beta, w2, b2


if __name__ == "__main__":
    key = jax.random.PRNGKey(0)
    kx, kp = jax.random.split(key)

    B, C, H, W = 20, 19, 16, 16   # module default: in_dim = 19 channels
    x = jax.random.normal(kx, (B, C, H, W), jnp.float32)
    params = init_params(kp, in_dim=C)

    # tb=8 -> 3 batch tiles with 4 padded rows: exercises the streamed grid, the
    # masked incremental BN statistics and the finalize step.
    out = wrn34_rot_out_branch(x, *params, tb=8)
    out = jax.block_until_ready(out)

    # float64 numpy reference of the original (unfused) forward pass.
    w1, b1, gamma, beta, w2, b2 = (np.asarray(p, np.float64) for p in params)
    xn = np.asarray(x, np.float64)
    pooled = xn.reshape(B, C, -1).mean(-1)
    h = pooled @ w1 + b1
    mean = h.mean(0, keepdims=True)
    var = ((h - mean) ** 2).mean(0, keepdims=True)
    h = (h - mean) / np.sqrt(var + BN_EPS) * gamma + beta
    ref = np.maximum(h, 0.0) @ w2 + b2

    assert out.shape == (B, 4), out.shape
    # Tolerance accounts for the bf16 activation stream (f32 accumulation kept).
    np.testing.assert_allclose(np.asarray(out), ref, atol=2e-2, rtol=2e-2)
    print("KERNEL_OK")
</pallas_src>

<mosaic_0001>
module attributes {stable_mosaic.version = 11 : i64} {
  func.func @_wrn34_rot_kernel(%arg0: i32, %arg1: memref<8x19x256xbf16, #tpu.memory_space<vmem>>, %arg2: memref<19x256xf32, #tpu.memory_space<vmem>>, %arg3: memref<1x256xf32, #tpu.memory_space<vmem>>, %arg4: memref<1x256xf32, #tpu.memory_space<vmem>>, %arg5: memref<1x256xf32, #tpu.memory_space<vmem>>, %arg6: memref<256x4xf32, #tpu.memory_space<vmem>>, %arg7: memref<1x4xf32, #tpu.memory_space<vmem>>, %arg8: memref<24x4xf32, #tpu.memory_space<vmem>>, %arg9: memref<24x256xf32, #tpu.memory_space<vmem>>, %arg10: memref<1x256xf32, #tpu.memory_space<vmem>>, %arg11: memref<1x256xf32, #tpu.memory_space<vmem>>) attributes {dimension_semantics = [#tpu.dimension_semantics<arbitrary>], iteration_bounds = array<i64: 3>, scalar_prefetch = 0 : i64, scratch_operands = 3 : i64, tpu.core_type = #tpu.core_type<tc>, window_params = [{transform_indices = @transform_0, window_bounds = array<i64: 8, 19, 256>}, {pipeline_mode = #tpu.pipeline_mode<synchronous>, transform_indices = @transform_1, window_bounds = array<i64: 19, 256>}, {pipeline_mode = #tpu.pipeline_mode<synchronous>, transform_indices = @transform_2, window_bounds = array<i64: 1, 256>}, {pipeline_mode = #tpu.pipeline_mode<synchronous>, transform_indices = @transform_3, window_bounds = array<i64: 1, 256>}, {pipeline_mode = #tpu.pipeline_mode<synchronous>, transform_indices = @transform_4, window_bounds = array<i64: 1, 256>}, {pipeline_mode = #tpu.pipeline_mode<synchronous>, transform_indices = @transform_5, window_bounds = array<i64: 256, 4>}, {pipeline_mode = #tpu.pipeline_mode<synchronous>, transform_indices = @transform_6, window_bounds = array<i64: 1, 4>}, {pipeline_mode = #tpu.pipeline_mode<synchronous>, transform_indices = @transform_7, window_bounds = array<i64: 24, 4>}]} {
    %c0_i32 = arith.constant 0 : i32
    %0 = arith.cmpi eq, %arg0, %c0_i32 : i32
    %1 = arith.extui %0 : i1 to i32
    %c0_i32_0 = arith.constant 0 : i32
    %2 = arith.cmpi ne, %1, %c0_i32_0 : i32
    scf.if %2 {
      %cst_22 = arith.constant 0.000000e+00 : f32
      %41 = vector.broadcast %cst_22 : f32 to vector<1x256xf32>
      %c0_23 = arith.constant 0 : index
      %c0_24 = arith.constant 0 : index
      %42 = vector.load %arg10[%c0_23, %c0_24] : memref<1x256xf32, #tpu.memory_space<vmem>>, vector<1x256xf32>
      tpu.vector_store %arg10[%c0_23, %c0_24], %41 {strides = array<i32>} : memref<1x256xf32, #tpu.memory_space<vmem>>, vector<1x256xf32>,
      %cst_25 = arith.constant 0.000000e+00 : f32
      %43 = vector.broadcast %cst_25 : f32 to vector<1x256xf32>
      %c0_26 = arith.constant 0 : index
      %c0_27 = arith.constant 0 : index
      %44 = vector.load %arg11[%c0_26, %c0_27] : memref<1x256xf32, #tpu.memory_space<vmem>>, vector<1x256xf32>
      tpu.vector_store %arg11[%c0_26, %c0_27], %43 {strides = array<i32>} : memref<1x256xf32, #tpu.memory_space<vmem>>, vector<1x256xf32>,
    } else {
    }
    %c0 = arith.constant 0 : index
    %c0_1 = arith.constant 0 : index
    %c0_2 = arith.constant 0 : index
    %3 = vector.load %arg1[%c0, %c0_1, %c0_2] : memref<8x19x256xbf16, #tpu.memory_space<vmem>>, vector<8x19x256xbf16>
    %4 = arith.extf %3 : vector<8x19x256xbf16> to vector<8x19x256xf32>
    %cst = arith.constant dense<0.000000e+00> : vector<8x19xf32>
    %5 = vector.multi_reduction <add>, %4, %cst [2] : vector<8x19x256xf32> to vector<8x19xf32>
    %cst_3 = arith.constant 3.906250e-03 : f32
    %6 = vector.broadcast %cst_3 : f32 to vector<8x19xf32>
    %7 = arith.mulf %5, %6 : vector<8x19xf32>
    %c0_4 = arith.constant 0 : index
    %c0_5 = arith.constant 0 : index
    %8 = vector.load %arg2[%c0_4, %c0_5] : memref<19x256xf32, #tpu.memory_space<vmem>>, vector<19x256xf32>
    %cst_6 = arith.constant dense<0.000000e+00> : vector<8x256xf32>
    %9 = tpu.matmul %7, %8, %cst_6 {dimension_numbers = #tpu.dot_dimension_numbers<[1], [0], [0], [1], [0, 0, 1, 1], [], []>} : vector<8x19xf32>, vector<19x256xf32>, vector<8x256xf32> -> vector<8x256xf32>
    %c0_7 = arith.constant 0 : index
    %c0_8 = arith.constant 0 : index
    %10 = vector.load %arg3[%c0_7, %c0_8] : memref<1x256xf32, #tpu.memory_space<vmem>>, vector<1x256xf32>
    %11 = vector.broadcast %10 : vector<1x256xf32> to vector<8x256xf32>
    %12 = arith.addf %9, %11 : vector<8x256xf32>
    %13 = tpu.iota {dimensions = array<i32: 0>} : vector<8x1xi32>
    %c8_i32 = arith.constant 8 : i32
    %14 = arith.muli %arg0, %c8_i32 : i32
    %15 = vector.broadcast %14 : i32 to vector<8x1xi32>
    %16 = arith.addi %13, %15 : vector<8x1xi32>
    %c20_i32 = arith.constant 20 : i32
    %17 = vector.broadcast %c20_i32 : i32 to vector<8x1xi32>
    %18 = arith.cmpi slt, %16, %17 : vector<8x1xi32>
    %19 = arith.extui %18 : vector<8x1xi1> to vector<8x1xi32>
    %20 = arith.sitofp %19 : vector<8x1xi32> to vector<8x1xf32>
    %21 = vector.broadcast %20 : vector<8x1xf32> to vector<8x256xf32>
    %22 = arith.mulf %12, %21 : vector<8x256xf32>
    %c0_9 = arith.constant 0 : index
    %c0_10 = arith.constant 0 : index
    %23 = vector.load %arg10[%c0_9, %c0_10] : memref<1x256xf32, #tpu.memory_space<vmem>>, vector<1x256xf32>
    %cst_11 = arith.constant dense<0.000000e+00> : vector<256xf32>
    %24 = vector.multi_reduction <add>, %22, %cst_11 [0] : vector<8x256xf32> to vector<256xf32>
    %25 = vector.shape_cast %24 : vector<256xf32> to vector<1x256xf32>
    %26 = arith.addf %23, %25 : vector<1x256xf32>
    %c0_12 = arith.constant 0 : index
    %c0_13 = arith.constant 0 : index
    %27 = vector.load %arg10[%c0_12, %c0_13] : memref<1x256xf32, #tpu.memory_space<vmem>>, vector<1x256xf32>
    tpu.vector_store %arg10[%c0_12, %c0_13], %26 {strides = array<i32>} : memref<1x256xf32, #tpu.memory_space<vmem>>, vector<1x256xf32>,
    %c0_14 = arith.constant 0 : index
    %c0_15 = arith.constant 0 : index
    %28 = vector.load %arg11[%c0_14, %c0_15] : memref<1x256xf32, #tpu.memory_space<vmem>>, vector<1x256xf32>
    %29 = arith.mulf %22, %22 : vector<8x256xf32>
    %cst_16 = arith.constant dense<0.000000e+00> : vector<256xf32>
    %30 = vector.multi_reduction <add>, %29, %cst_16 [0] : vector<8x256xf32> to vector<256xf32>
    %31 = vector.shape_cast %30 : vector<256xf32> to vector<1x256xf32>
    %32 = arith.addf %28, %31 : vector<1x256xf32>
    %c0_17 = arith.constant 0 : index
    %c0_18 = arith.constant 0 : index
    %33 = vector.load %arg11[%c0_17, %c0_18] : memref<1x256xf32, #tpu.memory_space<vmem>>, vector<1x256xf32>
    tpu.vector_store %arg11[%c0_17, %c0_18], %32 {strides = array<i32>} : memref<1x256xf32, #tpu.memory_space<vmem>>, vector<1x256xf32>,
    %c8_i32_19 = arith.constant 8 : i32
    %34 = arith.muli %arg0, %c8_i32_19 : i32
    %35 = tpu.assume_multiple %34, 8 : i32
    %36 = arith.index_cast %35 : i32 to index
    %c0_20 = arith.constant 0 : index
    %37 = vector.load %arg9[%36, %c0_20] : memref<24x256xf32, #tpu.memory_space<vmem>>, vector<8x256xf32>
    tpu.vector_store %arg9[%36, %c0_20], %12 {strides = array<i32>} : memref<24x256xf32, #tpu.memory_space<vmem>>, vector<8x256xf32>,
    %c2_i32 = arith.constant 2 : i32
    %38 = arith.cmpi eq, %arg0, %c2_i32 : i32
    %39 = arith.extui %38 : i1 to i32
    %c0_i32_21 = arith.constant 0 : i32
    %40 = arith.cmpi ne, %39, %c0_i32_21 : i32
    scf.if %40 {
      %c0_22 = arith.constant 0 : index
      %c0_23 = arith.constant 0 : index
      %41 = vector.load %arg10[%c0_22, %c0_23] : memref<1x256xf32, #tpu.memory_space<vmem>>, vector<1x256xf32>
      %cst_24 = arith.constant 5.000000e-02 : f32
      %42 = vector.broadcast %cst_24 : f32 to vector<1x256xf32>
      %43 = arith.mulf %41, %42 : vector<1x256xf32>
      %c0_25 = arith.constant 0 : index
      %c0_26 = arith.constant 0 : index
      %44 = vector.load %arg11[%c0_25, %c0_26] : memref<1x256xf32, #tpu.memory_space<vmem>>, vector<1x256xf32>
      %cst_27 = arith.constant 5.000000e-02 : f32
      %45 = vector.broadcast %cst_27 : f32 to vector<1x256xf32>
      %46 = arith.mulf %44, %45 : vector<1x256xf32>
      %47 = arith.mulf %43, %43 : vector<1x256xf32>
      %48 = arith.subf %46, %47 : vector<1x256xf32>
      %cst_28 = arith.constant 0.000000e+00 : f32
      %49 = vector.broadcast %cst_28 : f32 to vector<1x256xf32>
      %50 = arith.maximumf %48, %49 : vector<1x256xf32>
      %c0_29 = arith.constant 0 : index
      %c0_30 = arith.constant 0 : index
      %51 = vector.load %arg4[%c0_29, %c0_30] : memref<1x256xf32, #tpu.memory_space<vmem>>, vector<1x256xf32>
      %cst_31 = arith.constant 9.99999974E-6 : f32
      %52 = vector.broadcast %cst_31 : f32 to vector<1x256xf32>
      %53 = arith.addf %50, %52 : vector<1x256xf32>
      %54 = math.rsqrt %53 : vector<1x256xf32>
      %55 = arith.mulf %51, %54 : vector<1x256xf32>
      %c0_32 = arith.constant 0 : index
      %c0_33 = arith.constant 0 : index
      %56 = vector.load %arg5[%c0_32, %c0_33] : memref<1x256xf32, #tpu.memory_space<vmem>>, vector<1x256xf32>
      %57 = arith.mulf %43, %55 : vector<1x256xf32>
      %58 = arith.subf %56, %57 : vector<1x256xf32>
      %c0_34 = arith.constant 0 : index
      %c0_35 = arith.constant 0 : index
      %59 = vector.load %arg9[%c0_34, %c0_35] : memref<24x256xf32, #tpu.memory_space<vmem>>, vector<24x256xf32>
      %60 = vector.broadcast %55 : vector<1x256xf32> to vector<24x256xf32>
      %61 = arith.mulf %59, %60 : vector<24x256xf32>
      %62 = vector.broadcast %58 : vector<1x256xf32> to vector<24x256xf32>
      %63 = arith.addf %61, %62 : vector<24x256xf32>
      %cst_36 = arith.constant 0.000000e+00 : f32
      %64 = vector.broadcast %cst_36 : f32 to vector<24x256xf32>
      %65 = arith.maximumf %63, %64 : vector<24x256xf32>
      %c0_37 = arith.constant 0 : index
      %c0_38 = arith.constant 0 : index
      %66 = vector.load %arg6[%c0_37, %c0_38] : memref<256x4xf32, #tpu.memory_space<vmem>>, vector<256x4xf32>
      %cst_39 = arith.constant dense<0.000000e+00> : vector<24x4xf32>
      %67 = tpu.matmul %65, %66, %cst_39 {dimension_numbers = #tpu.dot_dimension_numbers<[1], [0], [0], [1], [0, 0, 1, 1], [], []>} : vector<24x256xf32>, vector<256x4xf32>, vector<24x4xf32> -> vector<24x4xf32>
      %c0_40 = arith.constant 0 : index
      %c0_41 = arith.constant 0 : index
      %68 = vector.load %arg7[%c0_40, %c0_41] : memref<1x4xf32, #tpu.memory_space<vmem>>, vector<1x4xf32>
      %69 = vector.broadcast %68 : vector<1x4xf32> to vector<24x4xf32>
      %70 = arith.addf %67, %69 : vector<24x4xf32>
      %c0_42 = arith.constant 0 : index
      %c0_43 = arith.constant 0 : index
      %71 = vector.load %arg8[%c0_42, %c0_43] : memref<24x4xf32, #tpu.memory_space<vmem>>, vector<24x4xf32>
      tpu.vector_store %arg8[%c0_42, %c0_43], %70 {strides = array<i32>} : memref<24x4xf32, #tpu.memory_space<vmem>>, vector<24x4xf32>,
    } else {
    }
    return
  }
  func.func @transform_0(%arg0: i32) -> (i32, i32, i32) {
    %c0_i32 = arith.constant 0 : i32
    %c0_i32_0 = arith.constant 0 : i32
    %c0_i32_1 = arith.constant 0 : i32
    return %arg0, %c0_i32, %c0_i32_0 : i32, i32, i32
  }
  func.func @transform_1(%arg0: i32) -> (i32, i32) {
    %c0_i32 = arith.constant 0 : i32
    %c0_i32_0 = arith.constant 0 : i32
    %c0_i32_1 = arith.constant 0 : i32
    return %c0_i32, %c0_i32_0 : i32, i32
  }
  func.func @transform_2(%arg0: i32) -> (i32, i32) {
    %c0_i32 = arith.constant 0 : i32
    %c0_i32_0 = arith.constant 0 : i32
    %c0_i32_1 = arith.constant 0 : i32
    return %c0_i32, %c0_i32_0 : i32, i32
  }
  func.func @transform_3(%arg0: i32) -> (i32, i32) {
    %c0_i32 = arith.constant 0 : i32
    %c0_i32_0 = arith.constant 0 : i32
    %c0_i32_1 = arith.constant 0 : i32
    return %c0_i32, %c0_i32_0 : i32, i32
  }
  func.func @transform_4(%arg0: i32) -> (i32, i32) {
    %c0_i32 = arith.constant 0 : i32
    %c0_i32_0 = arith.constant 0 : i32
    %c0_i32_1 = arith.constant 0 : i32
    return %c0_i32, %c0_i32_0 : i32, i32
  }
  func.func @transform_5(%arg0: i32) -> (i32, i32) {
    %c0_i32 = arith.constant 0 : i32
    %c0_i32_0 = arith.constant 0 : i32
    %c0_i32_1 = arith.constant 0 : i32
    return %c0_i32, %c0_i32_0 : i32, i32
  }
  func.func @transform_6(%arg0: i32) -> (i32, i32) {
    %c0_i32 = arith.constant 0 : i32
    %c0_i32_0 = arith.constant 0 : i32
    %c0_i32_1 = arith.constant 0 : i32
    return %c0_i32, %c0_i32_0 : i32, i32
  }
  func.func @transform_7(%arg0: i32) -> (i32, i32) {
    %c0_i32 = arith.constant 0 : i32
    %c0_i32_0 = arith.constant 0 : i32
    %c0_i32_1 = arith.constant 0 : i32
    return %c0_i32, %c0_i32_0 : i32, i32
  }
}

</mosaic_0001>

<bundles_post_ra>
// kernel: tpu_custom_call.1
= control target key start
LH: loop header
LB: loop body
LE: loop exit
PB: predicated region body
PF: predicated region fallthrough
CT: control target
= control target key end

     0   :  { %s971_s24 = smov 0   ;;  %s1233_s0 = inlined_call_operand.vmem [shape: bf16[24,19,256], index: 0, kind: input, shape index: {}]   ;;  %s1234_s1 = inlined_call_operand.vmem [shape: f32[19,256], index: 1, kind: input, shape index: {}]   ;;  %s1235_s2 = inlined_call_operand.vmem [shape: f32[1,256], index: 2, kind: input, shape index: {}]   ;;  %s1236_s3 = inlined_call_operand.vmem [shape: f32[1,256], index: 3, kind: input, shape index: {}]   ;;  %s1237_s4 = inlined_call_operand.vmem [shape: f32[1,256], index: 4, kind: input, shape index: {}]   ;;  %s1238_s5 = inlined_call_operand.vmem [shape: f32[256,4], index: 5, kind: input, shape index: {}]   ;;  %s1239_s6 = inlined_call_operand.vmem [shape: f32[1,4], index: 6, kind: input, shape index: {}]   ;;  %s1240_s7 = inlined_call_operand.vmem [shape: f32[24,4], index: 7, kind: output, shape index: {}]  }
   0x1 LB: > { %s977_s25 = sadd.s32 4294967295, %s927_s24   ;;  %p859_p0 = scmp.ge.s32.totalorder %s927_s24, 1  ;;  %s927_s24 = sphi %s971_s24, %s17_s24  }
   0x2   : > { %p234_p1 = scmp.lt.s32.totalorder %s927_s24, 4 }
   0x4   : > { %p235_p2 = pnand %p859_p0, %p234_p1 }
   0x5   : > { %s982_s26 = sshll.u32 (!%p235_p2), %s977_s25, 3  ;;  %p862_p4 = scmp.ne.s32.totalorder (!%p235_p2), %s977_s25, 0 }
   0x6   : > { %238 = sbr.rel (%p235_p2) target bundleno = 547 (0x223), region = 48  ;;  %p263_p3 = scmp.lt.s32.totalorder (!%p235_p2), %s982_s26, 23 }
   0xb   : > { %s264_s27 = scalar_select %p263_p3, %s982_s26, 23 }
   0xc   : > { %272 = sbr.rel (%p862_p4) target bundleno = 22 (0x16), region = 52 }
   0xd   : > { %s907_s28 = smul.u32 24, %s264_s27 }
   0xf   : > { %s989_s8 = scalar_lea.vmem %s1233_s0, %s907_s28 }
  0x11   : > { %v273_v0 = vlaneseq  ;;  %v929_v1 = vmov 0.0  }
  0x13   : > { %vm275_vm0 = vcmp.lt.s32.totalorder %v273_v0, 256 }
  0x14   : > { %277 = vst.msk [vmem:[#allocation3] sm:$0x3] %vm275_vm0, %v929_v1 }
  0x15   : > { %278 = vst.msk [vmem:[#allocation4] sm:$0x3] %vm275_vm0, %v929_v1 }
  0x16 PF: > { %v282_v2 = vld [vmem:[%s989_s8 + $0x18] sm:$0xff]  ;;  %v279_v3 = vld [vmem:[%s989_s8] sm:$0xff]  ;;  %v281_v4 = vld [vmem:[%s989_s8 + $0x10] sm:$0x33]  ;;  %vm357_vm1 = vcmask 1042432   ;;  %vm505_vm2 = vcmask 130112  }
  0x17   : > { %v309_v5 = vunpack.c.l.bf16 %v282_v2  ;;  %v310_v6 = vunpack.c.h.bf16 %v282_v2  ;;  %v303_v7 = vunpack.c.l.bf16 %v279_v3  ;;  %v304_v8 = vunpack.c.h.bf16 %v279_v3  ;;  %v283_v9 = vld [vmem:[%s989_s8 + $0x20] sm:$0xff]  ;;  %v284_v10 = vld [vmem:[%s989_s8 + $0x28] sm:$0x33]  ;;  %v286_v30 = vld [vmem:[%s989_s8 + $0x38] sm:$0xff]  ;;  %s666_s23 = sshra.s32 %s982_s26, 3  ;;  %p871_p5 = scmp.ne.s32.totalorder %s977_s25, 2 }
  0x18   : > { %v307_v11 = vunpack.c.l.bf16 %v281_v4  ;;  %v308_v12 = vunpack.c.h.bf16 %v281_v4  ;;  %v280_v13 = vld [vmem:[%s989_s8 + $0x8] sm:$0xff]  ;;  %v311_v16 = vunpack.c.l.bf16 %v283_v9  ;;  %v312_v19 = vunpack.c.h.bf16 %v283_v9  ;;  %v287_v29 = vld [vmem:[%s989_s8 + $0x40] sm:$0x33]  ;;  %v285_v31 = vld [vmem:[%s989_s8 + $0x30] sm:$0xff]  ;;  %s874_s27 = sshll.u32 %s666_s23, 4 }
  0x19   : > { %v363_v14 = vadd.f32 %v310_v6, %v309_v5  ;;  %v351_v15 = vadd.f32 %v304_v8, %v303_v7  ;;  %v313_v20 = vunpack.c.l.bf16 %v284_v10  ;;  %v305_v22 = vunpack.c.l.bf16 %v280_v13  ;;  %v290_v43 = vld [vmem:[%s989_s8 + $0x58] sm:$0x33]  ;;  %v289_v44 = vld [vmem:[%s989_s8 + $0x50] sm:$0xff]  ;;  %v288_v45 = vld [vmem:[%s989_s8 + $0x48] sm:$0xff]  ;;  %s670_s28 = scalar_lea.vmem [#allocation2], %s874_s27 }
  0x1a   : > { %v358_v17 = vsel %vm357_vm1, %v307_v11, 0.0  ;;  %v359_v18 = vsel %vm357_vm1, %v308_v12, 0.0  ;;  %v306_v23 = vunpack.c.h.bf16 %v280_v13  ;;  %v314_v24 = vunpack.c.h.bf16 %v284_v10  ;;  %v293_v57 = vld [vmem:[%s989_s8 + $0x70] sm:$0x33]  ;;  %v292_v58 = vld [vmem:[%s989_s8 + $0x68] sm:$0xff]  ;;  %v291_v59 = vld [vmem:[%s989_s8 + $0x60] sm:$0xff] }
  0x1b   : > { %364 = vadd.xlane.f32.xlu1 %v363_v14  ;;  %352 = vadd.xlane.f32.xlu0 %v351_v15  ;;  %v360_v21 = vadd.f32 %v359_v18, %v358_v17  ;;  %v369_v25 = vsel %vm357_vm1, %v313_v20, 0.0  ;;  %v366_v27 = vadd.f32 %v312_v19, %v311_v16  ;;  %v319_v33 = vunpack.c.l.bf16 %v287_v29  ;;  %v296_v7 = vld [vmem:[%s989_s8 + $0x88] sm:$0x33]  ;;  %v295_v8 = vld [vmem:[%s989_s8 + $0x80] sm:$0xff]  ;;  %v294_v9 = vld [vmem:[%s989_s8 + $0x78] sm:$0xff] }
  0x1c   : > { %v370_v26 = vsel %vm357_vm1, %v314_v24, 0.0  ;;  %v354_v28 = vadd.f32 %v306_v23, %v305_v22  ;;  %v320_v34 = vunpack.c.h.bf16 %v287_v29  ;;  %v317_v35 = vunpack.c.l.bf16 %v286_v30  ;;  %v298_v22 = vld [vmem:[%s989_s8 + $0x98] sm:$0xff]  ;;  %v297_v23 = vld [vmem:[%s989_s8 + $0x90] sm:$0xff] }
  0x1d   : > { %361 = vadd.xlane.f32.xlu2 %v360_v21  ;;  %v371_v32 = vadd.f32 %v370_v26, %v369_v25  ;;  %v318_v36 = vunpack.c.h.bf16 %v286_v30  ;;  %v315_v37 = vunpack.c.l.bf16 %v285_v31  ;;  %v316_v38 = vunpack.c.h.bf16 %v285_v31  ;;  %v299_v21 = vld [vmem:[%s989_s8 + $0xa0] sm:$0x33] }
  0x1e   : > { %v380_v39 = vsel %vm357_vm1, %v319_v33, 0.0  ;;  %v381_v40 = vsel %vm357_vm1, %v320_v34, 0.0  ;;  %v325_v47 = vunpack.c.l.bf16 %v290_v43  ;;  %v326_v48 = vunpack.c.h.bf16 %v290_v43 }
  0x1f   : > { %v377_v41 = vadd.f32 %v318_v36, %v317_v35  ;;  %v374_v42 = vadd.f32 %v316_v38, %v315_v37  ;;  %v382_v46 = vadd.f32 %v381_v40, %v380_v39  ;;  %v323_v49 = vunpack.c.l.bf16 %v289_v44  ;;  %v302_v35 = vld [vmem:[%s989_s8 + $0xb8] sm:$0x33]  ;;  %v301_v36 = vld [vmem:[%s989_s8 + $0xb0] sm:$0xff]  ;;  %v300_v37 = vld [vmem:[%s989_s8 + $0xa8] sm:$0xff] }
  0x20   : > { %v324_v50 = vunpack.c.h.bf16 %v289_v44  ;;  %v321_v51 = vunpack.c.l.bf16 %v288_v45  ;;  %v322_v52 = vunpack.c.h.bf16 %v288_v45  ;;  %v391_v53 = vsel %vm357_vm1, %v325_v47, 0.0 }
  0x21   : > { %v392_v54 = vsel %vm357_vm1, %v326_v48, 0.0  ;;  %v331_v61 = vunpack.c.l.bf16 %v293_v57  ;;  %v332_v62 = vunpack.c.h.bf16 %v293_v57  ;;  %v329_v63 = vunpack.c.l.bf16 %v292_v58 }
  0x22   : > { %v388_v55 = vadd.f32 %v324_v50, %v323_v49  ;;  %v385_v56 = vadd.f32 %v322_v52, %v321_v51  ;;  %v393_v60 = vadd.f32 %v392_v54, %v391_v53  ;;  %v330_v0 = vunpack.c.h.bf16 %v292_v58 }
  0x23   : > { %367 = vadd.xlane.f32.xlu1 %v366_v27  ;;  %355 = vadd.xlane.f32.xlu0 %v354_v28  ;;  %v327_v1 = vunpack.c.l.bf16 %v291_v59  ;;  %v328_v2 = vunpack.c.h.bf16 %v291_v59  ;;  %v402_v3 = vsel %vm357_vm1, %v331_v61, 0.0  ;;  %v403_v4 = vsel %vm357_vm1, %v332_v62, 0.0  ;;  %v468_v62 = vld [vmem:[%s1234_s1 + $0x20] sm:$0x7] }
  0x24   : > { %v399_v5 = vadd.f32 %v330_v0, %v329_v63  ;;  %v404_v10 = vadd.f32 %v403_v4, %v402_v3  ;;  %v337_v11 = vunpack.c.l.bf16 %v296_v7  ;;  %v338_v12 = vunpack.c.h.bf16 %v296_v7  ;;  %v469_v63 = vld [vmem:[%s1234_s1 + $0x28] sm:$0x7]  ;;  %863 = vmatpush.msk.msra.mxu0 %vm357_vm1, %v468_v62  ;;  %v466_v0 = vld [vmem:[%s1234_s1 + $0x10] sm:$0xff] }
  0x25   : > { %372 = vadd.xlane.f32.xlu2 %v371_v32  ;;  %v396_v6 = vadd.f32 %v328_v2, %v327_v1  ;;  %v335_v13 = vunpack.c.l.bf16 %v295_v8  ;;  %v336_v14 = vunpack.c.h.bf16 %v295_v8  ;;  %v333_v15 = vunpack.c.l.bf16 %v294_v9  ;;  %865 = vmatpush.msk.msra.mxu1 %vm357_vm1, %v469_v63  ;;  %v467_v1 = vld [vmem:[%s1234_s1 + $0x18] sm:$0xff]  ;;  %v464_v2 = vld [vmem:[%s1234_s1] sm:$0xff]  ;;  %v465_v3 = vld [vmem:[%s1234_s1 + $0x8] sm:$0xff] }
  0x26   : > { %v334_v16 = vunpack.c.h.bf16 %v294_v9  ;;  %v413_v17 = vsel %vm357_vm1, %v337_v11, 0.0  ;;  %v414_v18 = vsel %vm357_vm1, %v338_v12, 0.0  ;;  %v343_v25 = vunpack.c.l.bf16 %v299_v21  ;;  %583 = vmatpush.msra.mxu0 %v466_v0 }
  0x27   : > { %v410_v19 = vadd.f32 %v336_v14, %v335_v13  ;;  %v415_v24 = vadd.f32 %v414_v18, %v413_v17  ;;  %v344_v26 = vunpack.c.h.bf16 %v299_v21  ;;  %v341_v27 = vunpack.c.l.bf16 %v298_v22  ;;  %603 = vmatpush.msra.mxu1 %v467_v1 }
  0x28   : > { %v407_v20 = vadd.f32 %v334_v16, %v333_v15  ;;  %v342_v28 = vunpack.c.h.bf16 %v298_v22  ;;  %v339_v29 = vunpack.c.l.bf16 %v297_v23  ;;  %v340_v30 = vunpack.c.h.bf16 %v297_v23  ;;  %584 = vmatpush.msra.mxu0 %v464_v2 }
  0x29   : > { %v424_v31 = vsel %vm357_vm1, %v343_v25, 0.0  ;;  %v425_v32 = vsel %vm357_vm1, %v344_v26, 0.0  ;;  %v349_v39 = vunpack.c.l.bf16 %v302_v35  ;;  %v350_v40 = vunpack.c.h.bf16 %v302_v35  ;;  %604 = vmatpush.msra.mxu1 %v465_v3 }
  0x2a   : > { %v421_v33 = vadd.f32 %v342_v28, %v341_v27  ;;  %v418_v34 = vadd.f32 %v340_v30, %v339_v29  ;;  %v426_v38 = vadd.f32 %v425_v32, %v424_v31  ;;  %v345_v43 = vunpack.c.l.bf16 %v300_v37 }
  0x2b   : > { %378 = vadd.xlane.f32.xlu1 %v377_v41  ;;  %375 = vadd.xlane.f32.xlu0 %v374_v42  ;;  %v347_v41 = vunpack.c.l.bf16 %v301_v36  ;;  %v348_v42 = vunpack.c.h.bf16 %v301_v36  ;;  %v346_v44 = vunpack.c.h.bf16 %v300_v37  ;;  %v435_v45 = vsel %vm357_vm1, %v349_v39, 0.0 }
  0x2c   : > { %v500_v4 = vlaneseq  ;;  %vm509_vm3 = vcmask 195712   ;;  %vm546_vm4 = vcmask 1041409   ;;  %vm548_vm5 = vcmask 1042434  }
  0x2d   : > { %383 = vadd.xlane.f32.xlu2 %v382_v46  ;;  %v436_v46 = vsel %vm357_vm1, %v350_v40, 0.0  ;;  %v432_v47 = vadd.f32 %v348_v42, %v347_v41  ;;  %v429_v48 = vadd.f32 %v346_v44, %v345_v43  ;;  %vm550_vm6 = vcmask 1043459  }
  0x2e   : > { %v437_v49 = vadd.f32 %v436_v46, %v435_v45  ;;  %v1053_v8 = vand.u32 127, %v500_v4  ;;  %vm552_vm7 = vcmask 1044484   ;;  %vm554_vm8 = vcmask 1045509  }
  0x2f   : > { %vm556_vm9 = vcmask 1046534   ;;  %vm558_vm10 = vcmask 1047559   ;;  %vm560_vm11 = vcmask 154624   ;;  %vm635_vm13 = vcmask 1040384  }
  0x30   : > { %v1056_v9 = vadd.s32 4294967288, %v1053_v8  ;;  %v1059_v16 = vadd.s32 4294967280, %v1053_v8  ;;  %vm641_vm14 = vcmp.lt.s32.totalorder %v500_v4, 256 }
  0x33   : > { %389 = vadd.xlane.f32.xlu1 %v388_v55  ;;  %386 = vadd.xlane.f32.xlu0 %v385_v56 }
  0x35   : > { %394 = vadd.xlane.f32.xlu2 %v393_v60 }
  0x3b   : > { %400 = vadd.xlane.f32.xlu1 %v399_v5  ;;  %397 = vadd.xlane.f32.xlu0 %v396_v6 }
  0x3d   : > { %405 = vadd.xlane.f32.xlu2 %v404_v10 }
  0x43   : > { %411 = vadd.xlane.f32.xlu1 %v410_v19  ;;  %408 = vadd.xlane.f32.xlu0 %v407_v20 }
  0x45   : > { %416 = vadd.xlane.f32.xlu2 %v415_v24 }
  0x4b   : > { %422 = vadd.xlane.f32.xlu1 %v421_v33  ;;  %419 = vadd.xlane.f32.xlu0 %v418_v34 }
  0x4d   : > { %427 = vadd.xlane.f32.xlu2 %v426_v38 }
  0x53   : > { %433 = vadd.xlane.f32.xlu1 %v432_v47  ;;  %430 = vadd.xlane.f32.xlu0 %v429_v48 }
  0x55   : > { %438 = vadd.xlane.f32.xlu2 %v437_v49 }
  0x8e   : > { %v365_v50 = vpop.xlane.xlu1 %364  ;;  %v353_v51 = vpop.xlane.xlu0 %352 }
  0x8f   : > { %v443_v12 = vmul.f32 0.00390625, %v365_v50  ;;  %v440_v15 = vmul.f32 0.00390625, %v353_v51 }
  0x90   : > { %v362_v52 = vpop.xlane.xlu2 %361 }
  0x91   : > { %v442_v17 = vmul.f32 0.00390625, %v362_v52  ;;  %v511_v21 = vperm.slane %v443_v12, %v1053_v8  ;;  %v502_v24 = vperm.slane %v440_v15, %v1053_v8 }
  0x93   : > { %v508_v26 = vperm.slane %v442_v17, %v1059_v16 }
  0x96   : > { %v368_v53 = vpop.xlane.xlu1 %367  ;;  %v356_v54 = vpop.xlane.xlu0 %355 }
  0x97   : > { %v444_v10 = vmul.f32 0.00390625, %v368_v53  ;;  %v441_v11 = vmul.f32 0.00390625, %v356_v54 }
  0x98   : > { %v373_v55 = vpop.xlane.xlu2 %372 }
  0x99   : > { %v512_v18 = vperm.slane %v444_v10, %v1056_v9  ;;  %v504_v20 = vperm.slane %v441_v11, %v1056_v9  ;;  %v445_v25 = vmul.f32 0.00390625, %v373_v55 }
  0x9b   : > { %v513_v27 = vsel %vm505_vm2, %v512_v18, %v511_v21  ;;  %v506_v30 = vsel %vm505_vm2, %v504_v20, %v502_v24  ;;  %v514_v40 = vperm.slane %v445_v25, %v1059_v16 }
  0x9c   : > { %v510_v44 = vsel %vm509_vm3, %v508_v26, %v506_v30  ;;  %v612_v30 = vstv %s982_s26 }
  0x9e   : > { %v379_v56 = vpop.xlane.xlu1 %378  ;;  %v376_v57 = vpop.xlane.xlu0 %375 }
  0x9f   : > { %v447_v22 = vmul.f32 0.00390625, %v379_v56  ;;  %v446_v23 = vmul.f32 0.00390625, %v376_v57  ;;  %v515_v57 = vsel %vm509_vm3, %v514_v40, %v513_v27 }
  0xa0   : > { %v384_v58 = vpop.xlane.xlu2 %383  ;;  %v547_v2 = vsel %vm546_vm4, %v515_v57, %v510_v44 }
  0xa1   : > { %v448_v31 = vmul.f32 0.00390625, %v384_v58  ;;  %v517_v34 = vperm.slane %v447_v22, %v1056_v9  ;;  %v516_v35 = vperm.slane %v446_v23, %v1053_v8 }
  0xa3   : > { %v519_v49 = vperm.slane %v448_v31, %v1059_v16  ;;  %v518_v53 = vsel %vm505_vm2, %v517_v34, %v516_v35  ;;  %v930_v35 = vmov 0.0  }
  0xa5   : > { %v520_v63 = vsel %vm509_vm3, %v519_v49, %v518_v53 }
  0xa6   : > { %v390_v59 = vpop.xlane.xlu1 %389  ;;  %v387_v60 = vpop.xlane.xlu0 %386 }
  0xa7   : > { %v450_v28 = vmul.f32 0.00390625, %v390_v59  ;;  %v449_v29 = vmul.f32 0.00390625, %v387_v60 }
  0xa8   : > { %v395_v61 = vpop.xlane.xlu2 %394 }
  0xa9   : > { %v451_v41 = vmul.f32 0.00390625, %v395_v61  ;;  %v522_v45 = vperm.slane %v450_v28, %v1056_v9  ;;  %v521_v46 = vperm.slane %v449_v29, %v1053_v8  ;;  %v610_v29 = vshrl.u32 %v500_v4, 7 }
  0xab   : > { %v524_v58 = vperm.slane %v451_v41, %v1059_v16  ;;  %v523_v61 = vsel %vm505_vm2, %v522_v45, %v521_v46  ;;  %v613_v31 = vadd.s32 %v612_v30, %v610_v29 }
  0xad   : > { %v525_v10 = vsel %vm509_vm3, %v524_v58, %v523_v61  ;;  %vm614_vm12 = vcmp.lt.s32.totalorder %v613_v31, 20 }
  0xae   : > { %v401_v5 = vpop.xlane.xlu1 %400  ;;  %v398_v6 = vpop.xlane.xlu0 %397 }
  0xaf   : > { %v453_v32 = vmul.f32 0.00390625, %v401_v5  ;;  %v452_v33 = vmul.f32 0.00390625, %v398_v6 }
  0xb0   : > { %v406_v7 = vpop.xlane.xlu2 %405 }
  0xb1   : > { %v454_v47 = vmul.f32 0.00390625, %v406_v7  ;;  %v527_v50 = vperm.slane %v453_v32, %v1056_v9  ;;  %v526_v51 = vperm.slane %v452_v33, %v1053_v8 }
  0xb3   : > { %v529_v62 = vperm.slane %v454_v47, %v1059_v16  ;;  %v528_v0 = vsel %vm505_vm2, %v527_v50, %v526_v51 }
  0xb5   : > { %v530_v15 = vsel %vm509_vm3, %v529_v62, %v528_v0 }
  0xb6   : > { %v412_v13 = vpop.xlane.xlu1 %411  ;;  %v409_v14 = vpop.xlane.xlu0 %408 }
  0xb7   : > { %v456_v36 = vmul.f32 0.00390625, %v412_v13  ;;  %v455_v37 = vmul.f32 0.00390625, %v409_v14  ;;  %v549_v14 = vsel %vm548_vm5, %v520_v63, %v547_v2  ;;  %v619_v2 = vld [vmem:[#allocation3] sm:$0x3] }
  0xb8   : > { %v417_v19 = vpop.xlane.xlu2 %416  ;;  %v551_v22 = vsel %vm550_vm6, %v525_v10, %v549_v14  ;;  %v644_v10 = vld [vmem:[#allocation4] sm:$0x3] }
  0xb9   : > { %v457_v52 = vmul.f32 0.00390625, %v417_v19  ;;  %v532_v54 = vperm.slane %v456_v36, %v1056_v9  ;;  %v531_v55 = vperm.slane %v455_v37, %v1053_v8  ;;  %v553_v26 = vsel %vm552_vm7, %v530_v15, %v551_v22 }
  0xba   : > { %v868_v36 = vsel %vm614_vm12, 1.0, %v930_v35 }
  0xbb   : > { %v534_v1 = vperm.slane %v457_v52, %v1059_v16  ;;  %v533_v3 = vsel %vm505_vm2, %v532_v54, %v531_v55 }
  0xbd   : > { %v535_v18 = vsel %vm509_vm3, %v534_v1, %v533_v3 }
  0xbe   : > { %v423_v38 = vpop.xlane.xlu1 %422  ;;  %v420_v39 = vpop.xlane.xlu0 %419  ;;  %v555_v27 = vsel %vm554_vm8, %v535_v18, %v553_v26 }
  0xbf   : > { %v459_v42 = vmul.f32 0.00390625, %v423_v38  ;;  %v458_v43 = vmul.f32 0.00390625, %v420_v39 }
  0xc0   : > { %v428_v48 = vpop.xlane.xlu2 %427 }
  0xc1   : > { %v460_v56 = vmul.f32 0.00390625, %v428_v48  ;;  %v537_v59 = vperm.slane %v459_v42, %v1056_v9  ;;  %v536_v60 = vperm.slane %v458_v43, %v1053_v8 }
  0xc3   : > { %v539_v5 = vperm.slane %v460_v56, %v1059_v16  ;;  %v538_v11 = vsel %vm505_vm2, %v537_v59, %v536_v60 }
  0xc5   : > { %v540_v23 = vsel %vm509_vm3, %v539_v5, %v538_v11 }
  0xc6   : > { %v434_v6 = vpop.xlane.xlu1 %433  ;;  %v431_v7 = vpop.xlane.xlu0 %430  ;;  %v557_v28 = vsel %vm556_vm9, %v540_v23, %v555_v27 }
  0xc7   : > { %v462_v12 = vmul.f32 0.00390625, %v434_v6  ;;  %v461_v13 = vmul.f32 0.00390625, %v431_v7 }
  0xc8   : > { %v439_v17 = vpop.xlane.xlu2 %438 }
  0xc9   : > { %v542_v19 = vperm.slane %v462_v12, %v1056_v9  ;;  %v541_v20 = vperm.slane %v461_v13, %v1053_v8  ;;  %v463_v21 = vmul.f32 0.00390625, %v439_v17 }
  0xcb   : > { %v544_v24 = vperm.slane %v463_v21, %v1059_v16  ;;  %v543_v25 = vsel %vm505_vm2, %v542_v19, %v541_v20  ;;  %v470_v16 = vld [vmem:[%s1235_s2] sm:$0x3] }
  0xcc   : > { %v472_v32 = vperm.slane %v470_v16, 0  ;;  %v473_v33 = vperm.slane %v470_v16, 1 }
  0xcd   : > { %v545_v9 = vsel %vm509_vm3, %v544_v24, %v543_v25 }
  0xce   : > { %v559_v8 = vsel %vm558_vm10, %v545_v9, %v557_v28 }
  0xcf   : > { %864 = vmatmul.msk.f32.vlgmr.msra.gmra.mxu0 %vm560_vm11, %v559_v8  ;;  %866 = vmatmul.msk.f32.vlgmr.msra.gmra.mxu1 %vm560_vm11, %v559_v8 }
 0x14c   : > { %v586_v34 = vpop.f32.mrf.mxu0  ;;  %v606_v37 = vpop.f32.mrf.mxu1 }
 0x14d   : > { %v587_v38 = vadd.f32 %v586_v34, %v472_v32  ;;  %v607_v39 = vadd.f32 %v606_v37, %v473_v33 }
 0x14f   : > { %v617_v40 = vmul.f32 %v868_v36, %v587_v38  ;;  %671 = vst [vmem:[%s670_s28] sm:$0xff] %v587_v38  ;;  %v618_v41 = vmul.f32 %v868_v36, %v607_v39 }
 0x150   : > { %672 = vst [vmem:[%s670_s28 + $0x8] sm:$0xff] %v607_v39 }
 0x151   : > { %v620_v42 = vrot.slane %v617_v40, 4  ;;  %v645_v43 = vmul.f32 %v617_v40, %v617_v40  ;;  %v626_v44 = vrot.slane %v618_v41, 4  ;;  %v646_v45 = vmul.f32 %v618_v41, %v618_v41 }
 0x153   : > { %v621_v46 = vadd.f32 %v620_v42, %v617_v40  ;;  %v647_v47 = vrot.slane %v645_v43, 4  ;;  %v627_v48 = vadd.f32 %v626_v44, %v618_v41  ;;  %v653_v49 = vrot.slane %v646_v45, 4 }
 0x155   : > { %v622_v50 = vrot.slane %v621_v46, 2  ;;  %v648_v51 = vadd.f32 %v647_v47, %v645_v43  ;;  %v628_v52 = vrot.slane %v627_v48, 2  ;;  %v654_v53 = vadd.f32 %v653_v49, %v646_v45 }
 0x157   : > { %v623_v54 = vadd.f32 %v622_v50, %v621_v46  ;;  %v649_v55 = vrot.slane %v648_v51, 2  ;;  %v629_v56 = vadd.f32 %v628_v52, %v627_v48  ;;  %v655_v57 = vrot.slane %v654_v53, 2 }
 0x159   : > { %v624_v58 = vrot.slane %v623_v54, 1  ;;  %v650_v59 = vadd.f32 %v649_v55, %v648_v51  ;;  %v630_v60 = vrot.slane %v629_v56, 1  ;;  %v656_v61 = vadd.f32 %v655_v57, %v654_v53 }
 0x15b   : > { %v651_v62 = vrot.slane %v650_v59, 1  ;;  %v631_v63 = vadd.f32 %v630_v60, %v629_v56  ;;  %v657_v0 = vrot.slane %v656_v61, 1  ;;  %v625_v1 = vadd.f32 %v624_v58, %v623_v54 }
 0x15d   : > { %v634_v3 = vrot.slane %v631_v63, 7  ;;  %v658_v5 = vadd.f32 %v657_v0, %v656_v61  ;;  %v652_v6 = vadd.f32 %v651_v62, %v650_v59 }
 0x15f   : > { %v636_v7 = vsel %vm635_vm13, %v625_v1, %v634_v3  ;;  %v661_v11 = vrot.slane %v658_v5, 7 }
 0x160   : > { %v638_v12 = vadd.f32 %v636_v7, %v619_v2  ;;  %676 = sbr.rel (%p871_p5) target bundleno = 547 (0x223), region = 56 }
 0x161   : > { %v662_v13 = vsel %vm635_vm13, %v652_v6, %v661_v11 }
 0x162   : > { %643 = vst.msk [vmem:[#allocation3] sm:$0x3] %vm641_vm14, %v638_v12  ;;  %v664_v14 = vadd.f32 %v662_v13, %v644_v10 }
 0x164   : > { %665 = vst.msk [vmem:[#allocation4] sm:$0x3] %vm641_vm14, %v664_v14 }
 0x165   : > { %v749_v15 = vld [vmem:[%s1238_s5 + $0x78] sm:$0xff]  ;;  %v748_v17 = vld [vmem:[%s1238_s5 + $0x70] sm:$0xff]  ;;  %v747_v19 = vld [vmem:[%s1238_s5 + $0x68] sm:$0xff]  ;;  %vm822_vm2 = vcmask 31744  }
 0x166   : > { %v765_v4 = vld [vmem:[%s1238_s5 + $0xf8] sm:$0xff]  ;;  %875 = vmatpush.msra.mxu2 %v749_v15  ;;  %v764_v18 = vld [vmem:[%s1238_s5 + $0xf0] sm:$0xff]  ;;  %v763_v20 = vld [vmem:[%s1238_s5 + $0xe8] sm:$0xff]  ;;  %770 = vmatpush.msra.mxu0 %v749_v15 }
 0x167   : > { %891 = vmatpush.msra.mxu3 %v765_v4  ;;  %796 = vmatpush.msra.mxu1 %v765_v4  ;;  %v746_v21 = vld [vmem:[%s1238_s5 + $0x60] sm:$0xff]  ;;  %v745_v23 = vld [vmem:[%s1238_s5 + $0x58] sm:$0xff]  ;;  %v744_v25 = vld [vmem:[%s1238_s5 + $0x50] sm:$0xff] }
 0x168   : > { %876 = vmatpush.msra.mxu2 %v748_v17  ;;  %v762_v22 = vld [vmem:[%s1238_s5 + $0xe0] sm:$0xff]  ;;  %771 = vmatpush.msra.mxu0 %v748_v17  ;;  %v761_v24 = vld [vmem:[%s1238_s5 + $0xd8] sm:$0xff]  ;;  %v760_v26 = vld [vmem:[%s1238_s5 + $0xd0] sm:$0xff] }
 0x169   : > { %892 = vmatpush.msra.mxu3 %v764_v18  ;;  %797 = vmatpush.msra.mxu1 %v764_v18  ;;  %v743_v27 = vld [vmem:[%s1238_s5 + $0x48] sm:$0xff]  ;;  %v677_v28 = vld [vmem:[#allocation3] sm:$0x3]  ;;  %v742_v31 = vld [vmem:[%s1238_s5 + $0x40] sm:$0xff] }
 0x16a   : > { %877 = vmatpush.msra.mxu2 %v747_v19  ;;  %772 = vmatpush.msra.mxu0 %v747_v19  ;;  %v759_v9 = vld [vmem:[%s1238_s5 + $0xc8] sm:$0xff]  ;;  %v1153_v29 = vmul.f32 0.05, %v677_v28  ;;  %v758_v16 = vld [vmem:[%s1238_s5 + $0xc0] sm:$0xff]  ;;  %v741_v33 = vld [vmem:[%s1238_s5 + $0x38] sm:$0xff] }
 0x16b   : > { %893 = vmatpush.msra.mxu3 %v763_v20  ;;  %798 = vmatpush.msra.mxu1 %v763_v20  ;;  %v679_v8 = vld [vmem:[#allocation4] sm:$0x3]  ;;  %v757_v34 = vld [vmem:[%s1238_s5 + $0xb8] sm:$0xff]  ;;  %v739_v39 = vld [vmem:[%s1238_s5 + $0x28] sm:$0xff] }
 0x16c   : > { %878 = vmatpush.msra.mxu2 %v746_v21  ;;  %773 = vmatpush.msra.mxu0 %v746_v21  ;;  %v680_v30 = vmul.f32 0.05, %v679_v8  ;;  %v681_v32 = vmul.f32 %v1153_v29, %v1153_v29  ;;  %v740_v36 = vld [vmem:[%s1238_s5 + $0x30] sm:$0xff]  ;;  %v755_v40 = vld [vmem:[%s1238_s5 + $0xa8] sm:$0xff]  ;;  %v738_v42 = vld [vmem:[%s1238_s5 + $0x20] sm:$0xff] }
 0x16d   : > { %894 = vmatpush.msra.mxu3 %v762_v22  ;;  %799 = vmatpush.msra.mxu1 %v762_v22  ;;  %v756_v37 = vld [vmem:[%s1238_s5 + $0xb0] sm:$0xff]  ;;  %v754_v43 = vld [vmem:[%s1238_s5 + $0xa0] sm:$0xff]  ;;  %v737_v44 = vld [vmem:[%s1238_s5 + $0x18] sm:$0xff] }
 0x16e   : > { %879 = vmatpush.msra.mxu2 %v745_v23  ;;  %774 = vmatpush.msra.mxu0 %v745_v23  ;;  %v682_v35 = vsub.f32 %v680_v30, %v681_v32  ;;  %v753_v45 = vld [vmem:[%s1238_s5 + $0x98] sm:$0xff]  ;;  %v736_v46 = vld [vmem:[%s1238_s5 + $0x10] sm:$0xff]  ;;  %v735_v48 = vld [vmem:[%s1238_s5 + $0x8] sm:$0xff] }
 0x16f   : > { %895 = vmatpush.msra.mxu3 %v761_v24  ;;  %800 = vmatpush.msra.mxu1 %v761_v24  ;;  %v752_v47 = vld [vmem:[%s1238_s5 + $0x90] sm:$0xff]  ;;  %v751_v49 = vld [vmem:[%s1238_s5 + $0x88] sm:$0xff]  ;;  %v734_v51 = vld [vmem:[%s1238_s5] sm:$0xff] }
 0x170   : > { %880 = vmatpush.msra.mxu2 %v744_v25  ;;  %775 = vmatpush.msra.mxu0 %v744_v25  ;;  %v683_v38 = vmax.f32 %v682_v35, 0.0  ;;  %v750_v53 = vld [vmem:[%s1238_s5 + $0x80] sm:$0xff]  ;;  %v702_v62 = vld [vmem:[#allocation2 + $0x10] sm:$0xff]  ;;  %v703_v63 = vld [vmem:[#allocation2 + $0x18] sm:$0xff] }
 0x171   : > { %896 = vmatpush.msra.mxu3 %v760_v26  ;;  %801 = vmatpush.msra.mxu1 %v760_v26  ;;  %v684_v57 = vld [vmem:[%s1236_s3] sm:$0x3]  ;;  %v701_v5 = vld [vmem:[#allocation2 + $0x8] sm:$0xff] }
 0x172   : > { %881 = vmatpush.msra.mxu2 %v743_v27  ;;  %776 = vmatpush.msra.mxu0 %v743_v27  ;;  %v685_v41 = vadd.f32 1e-05, %v683_v38  ;;  %v697_v61 = vld [vmem:[%s1237_s4] sm:$0x3]  ;;  %v705_v12 = vld [vmem:[#allocation2 + $0x28] sm:$0xff] }
 0x173   : > { %897 = vmatpush.msra.mxu3 %v759_v9  ;;  %802 = vmatpush.msra.mxu1 %v759_v9  ;;  %v700_v3 = vld [vmem:[#allocation2] sm:$0xff] }
 0x174   : > { %882 = vmatpush.msra.mxu2 %v742_v31  ;;  %777 = vmatpush.msra.mxu0 %v742_v31  ;;  %919 = vrsqrt.f32 %v685_v41  ;;  %vm692_vm15 = vweird.f32 %v685_v41  ;;  %v704_v11 = vld [vmem:[#allocation2 + $0x20] sm:$0xff] }
 0x175   : > { %898 = vmatpush.msra.mxu3 %v758_v16  ;;  %803 = vmatpush.msra.mxu1 %v758_v16 }
 0x176   : > { %883 = vmatpush.msra.mxu2 %v741_v33  ;;  %778 = vmatpush.msra.mxu0 %v741_v33 }
 0x177   : > { %899 = vmatpush.msra.mxu3 %v757_v34  ;;  %804 = vmatpush.msra.mxu1 %v757_v34 }
 0x178   : > { %884 = vmatpush.msra.mxu2 %v740_v36  ;;  %779 = vmatpush.msra.mxu0 %v740_v36 }
 0x179   : > { %900 = vmatpush.msra.mxu3 %v756_v37  ;;  %805 = vmatpush.msra.mxu1 %v756_v37 }
 0x17a   : > { %885 = vmatpush.msra.mxu2 %v739_v39  ;;  %780 = vmatpush.msra.mxu0 %v739_v39  ;;  %v920_v50 = vpop.eup %919 }
 0x17b   : > { %901 = vmatpush.msra.mxu3 %v755_v40  ;;  %806 = vmatpush.msra.mxu1 %v755_v40  ;;  %v687_v52 = vmul.f32 %v920_v50, %v685_v41  ;;  %vm693_vm0 = vweird.f32 %v920_v50 }
 0x17c   : > { %886 = vmatpush.msra.mxu2 %v738_v42  ;;  %781 = vmatpush.msra.mxu0 %v738_v42  ;;  %vm694_vm1 = vmor %vm692_vm15, %vm693_vm0 }
 0x17d   : > { %902 = vmatpush.msra.mxu3 %v754_v43  ;;  %807 = vmatpush.msra.mxu1 %v754_v43  ;;  %v688_v54 = vmul.f32 %v920_v50, %v687_v52 }
 0x17e   : > { %887 = vmatpush.msra.mxu2 %v737_v44  ;;  %782 = vmatpush.msra.mxu0 %v737_v44 }
 0x17f   : > { %903 = vmatpush.msra.mxu3 %v753_v45  ;;  %808 = vmatpush.msra.mxu1 %v753_v45  ;;  %v689_v55 = vmul.f32 0.5, %v688_v54 }
 0x180   : > { %888 = vmatpush.msra.mxu2 %v736_v46  ;;  %783 = vmatpush.msra.mxu0 %v736_v46 }
 0x181   : > { %904 = vmatpush.msra.mxu3 %v752_v47  ;;  %809 = vmatpush.msra.mxu1 %v752_v47  ;;  %v690_v56 = vsub.f32 1.5, %v689_v55 }
 0x182   : > { %889 = vmatpush.msra.mxu2 %v735_v48  ;;  %784 = vmatpush.msra.mxu0 %v735_v48 }
 0x183   : > { %905 = vmatpush.msra.mxu3 %v751_v49  ;;  %810 = vmatpush.msra.mxu1 %v751_v49  ;;  %v691_v58 = vmul.f32 %v920_v50, %v690_v56 }
 0x184   : > { %890 = vmatpush.msra.mxu2 %v734_v51  ;;  %785 = vmatpush.msra.mxu0 %v734_v51 }
 0x185   : > { %906 = vmatpush.msra.mxu3 %v750_v53  ;;  %811 = vmatpush.msra.mxu1 %v750_v53  ;;  %v695_v59 = vsel %vm694_vm1, %v920_v50, %v691_v58 }
 0x186   : > { %v696_v60 = vmul.f32 %v695_v59, %v684_v57 }
 0x188   : > { %v698_v0 = vmul.f32 %v696_v60, %v1153_v29  ;;  %v707_v1 = vperm.slane %v696_v60, 0  ;;  %v708_v2 = vperm.slane %v696_v60, 1  ;;  %v918_v29 = vld [vmem:[%s1239_s6] ss:$0 sm:$0xff] }
 0x18a   : > { %v699_v6 = vsub.f32 %v697_v61, %v698_v0  ;;  %v713_v7 = vmul.f32 %v707_v1, %v702_v62  ;;  %v714_v10 = vmul.f32 %v708_v2, %v703_v63  ;;  %v711_v13 = vmul.f32 %v707_v1, %v700_v3 }
 0x18b   : > { %v712_v14 = vmul.f32 %v708_v2, %v701_v5  ;;  %v715_v19 = vmul.f32 %v707_v1, %v704_v11  ;;  %v716_v20 = vmul.f32 %v708_v2, %v705_v12 }
 0x18c   : > { %v718_v15 = vperm.slane %v699_v6, 0  ;;  %v719_v17 = vperm.slane %v699_v6, 1 }
 0x18e   : > { %v724_v4 = vadd.f32 %v718_v15, %v713_v7  ;;  %v725_v18 = vadd.f32 %v719_v17, %v714_v10  ;;  %v722_v21 = vadd.f32 %v718_v15, %v711_v13  ;;  %v723_v22 = vadd.f32 %v719_v17, %v712_v14 }
 0x18f   : > { %v726_v27 = vadd.f32 %v718_v15, %v715_v19  ;;  %v727_v9 = vadd.f32 %v719_v17, %v716_v20 }
 0x190   : > { %v730_v23 = vmax.f32 %v724_v4, 0.0  ;;  %v731_v24 = vmax.f32 %v725_v18, 0.0  ;;  %v728_v25 = vmax.f32 %v722_v21, 0.0  ;;  %v729_v26 = vmax.f32 %v723_v22, 0.0 }
 0x191   : > { %v732_v28 = vmax.f32 %v726_v27, 0.0  ;;  %v733_v8 = vmax.f32 %v727_v9, 0.0 }
 0x192   : > { %789 = vmatmul.f32.vlgmr.msra.gmra.mxu2 %v730_v23  ;;  %815 = vmatmul.f32.vlgmr.msra.gmra.mxu3 %v731_v24 }
 0x193   : > { %786 = vmatmul.f32.vlgmr.msra.gmra.mxu0 %v728_v25  ;;  %812 = vmatmul.f32.vlgmr.msra.gmra.mxu1 %v729_v26 }
 0x19a   : > { %792 = vmatmul.f32.gmra.mxu2 %v732_v28  ;;  %818 = vmatmul.f32.gmra.mxu3 %v733_v8 }
 0x210   : > { %v787_v30 = vpop.f32.mrf.mxu0  ;;  %v813_v31 = vpop.f32.mrf.mxu1 }
 0x211   : > { %v788_v16 = vadd.f32 %v918_v29, %v787_v30 }
 0x213   : > { %v814_v32 = vadd.f32 %v813_v31, %v788_v16 }
 0x215   : > { %v790_v33 = vpop.f32.mrf.mxu2  ;;  %v816_v34 = vpop.f32.mrf.mxu3  ;;  %823 = vst.msk [vmem:[%s1240_s7] sm:$0xff] %vm822_vm2, %v814_v32 }
 0x216   : > { %v791_v35 = vadd.f32 %v918_v29, %v790_v33 }
 0x218   : > { %v817_v36 = vadd.f32 %v816_v34, %v791_v35 }
 0x21a   : > { %824 = vst.msk [vmem:[%s1240_s7 + $0x8] sm:$0xff] %vm822_vm2, %v817_v36 }
 0x21d   : > { %v793_v37 = vpop.f32.mrf.mxu2  ;;  %v819_v38 = vpop.f32.mrf.mxu3 }
 0x21e   : > { %v794_v39 = vadd.f32 %v918_v29, %v793_v37 }
 0x220   : > { %v820_v40 = vadd.f32 %v819_v38, %v794_v39 }
 0x222   : > { %825 = vst.msk [vmem:[%s1240_s7 + $0x10] sm:$0xff] %vm822_vm2, %v820_v40 }
 0x223 PF: > { %s17_s24 = sadd.s32 1, %s927_s24  }
 0x224   : > { %p14_p6 = scmp.ge.s32.totalorder %s17_s24, 5  }
 0x226   :  { %16 = sbr.rel (!%p14_p6) target bundleno = 1 (0x1), region = 83 }

</bundles_post_ra>
